<compile_context>
chip_gen: v7x
topology: tpu7x:2x2x1
jax: 0.10.0
libtpu: 0.0.40
codegen_flags: <defaults>
</compile_context>

<pallas_src>
import functools

import jax
import jax.numpy as jnp
from jax.experimental import pallas as pl
from jax.experimental.pallas import tpu as pltpu

# ---- "config" (deterministic, in-script; mirrors conf.get_* in __init__) ----
INFINITY_PTS_MARGIN = 1e-4
NORMALIZE_GRAD = False
HINGE_LOSS = True
HINGE_LOSS_WEIGHT = 1.0 if HINGE_LOSS else 0.0


def _esfm_kernel(ps_ref, pts3d_ref, normm_ref, valid_ref, num_ref, den_ref,
                 *, margin, hinge_loss, hinge_w):
    # grid = (num_point_tiles, num_cameras): cameras are the inner (serial)
    # axis so the pts3D tile stays resident in VMEM and the per-tile output
    # accumulators are revisited across all cameras.
    m = pl.program_id(1)

    @pl.when(m == 0)
    def _init():
        num_ref[...] = jnp.zeros_like(num_ref)
        den_ref[...] = jnp.zeros_like(den_ref)

    x0 = pts3d_ref[0]   # [rows, 128]
    x1 = pts3d_ref[1]
    x2 = pts3d_ref[2]
    x3 = pts3d_ref[3]

    base = m * 12

    def proj_row(i):
        # 4 scalar*vector FMAs on the VPU; P entries are cheap SMEM reads.
        return (ps_ref[base + 4 * i + 0] * x0
                + ps_ref[base + 4 * i + 1] * x1
                + ps_ref[base + 4 * i + 2] * x2
                + ps_ref[base + 4 * i + 3] * x3)

    u = proj_row(0)
    v = proj_row(1)
    w = proj_row(2)

    if hinge_loss:
        projected = w > margin
    else:
        projected = jnp.abs(w) > margin

    hinge = (margin - w) * hinge_w
    safe_w = jnp.where(projected, w, jnp.ones_like(w))
    inv_w = pl.reciprocal(safe_w)          # exact; uses the EUP slot

    du = u * inv_w - normm_ref[0, 0]
    dv = v * inv_w - normm_ref[0, 1]
    reproj = jnp.sqrt(du * du + dv * dv)

    per_pt = jnp.where(projected, reproj, hinge)
    valid = valid_ref[0]                   # [rows, 128] f32 0/1 mask

    # Elementwise VPU accumulation only; cross-lane reduce happens once in JAX.
    num_ref[...] += per_pt * valid
    den_ref[...] += valid


def esfm_loss_pallas(Ps, pts3D, norm_M, valid_pts, *, max_tile_n=131072):
    """Ps: [M,3,4], pts3D: [4,N], norm_M: [M,2,N], valid_pts: [M,N] bool."""
    assert max_tile_n % 1024 == 0, "max_tile_n must be a multiple of 1024"
    M = Ps.shape[0]
    N = pts3D.shape[1]

    # Pad the point axis to a multiple of 1024 (full 8x128 vregs) and, when
    # multiple tiles are needed, to a multiple of the tile size. Padded points
    # carry valid=0 so they never contribute to the loss.
    Np = ((N + 1023) // 1024) * 1024
    tile_n = min(max_tile_n, Np)
    Np = ((Np + tile_n - 1) // tile_n) * tile_n
    pad = Np - N
    if pad:
        pts3D = jnp.pad(pts3D, ((0, 0), (0, pad)))
        norm_M = jnp.pad(norm_M, ((0, 0), (0, 0), (0, pad)))
        valid_pts = jnp.pad(valid_pts, ((0, 0), (0, pad)))

    rows = tile_n // 128          # sublane rows per point tile (>= 8)
    nb = Np // 128                # total 128-lane rows
    n_tiles = Np // tile_n

    ps_flat = Ps.astype(jnp.float32).reshape(M * 12)              # SMEM
    pts3d_r = pts3D.astype(jnp.float32).reshape(4, nb, 128)
    normm_r = norm_M.astype(jnp.float32).reshape(M, 2, nb, 128)
    valid_r = valid_pts.reshape(M, nb, 128).astype(jnp.float32)

    kernel = functools.partial(
        _esfm_kernel,
        margin=INFINITY_PTS_MARGIN,
        hinge_loss=HINGE_LOSS,
        hinge_w=HINGE_LOSS_WEIGHT,
    )

    num, den = pl.pallas_call(
        kernel,
        out_shape=(jax.ShapeDtypeStruct((nb, 128), jnp.float32),
                   jax.ShapeDtypeStruct((nb, 128), jnp.float32)),
        grid=(n_tiles, M),
        in_specs=[
            pl.BlockSpec(memory_space=pltpu.MemorySpace.SMEM),           # Ps
            pl.BlockSpec((4, rows, 128), lambda n, m: (0, n, 0)),        # pts3D
            pl.BlockSpec((1, 2, rows, 128), lambda n, m: (m, 0, n, 0)),  # norm_M
            pl.BlockSpec((1, rows, 128), lambda n, m: (m, n, 0)),        # valid
        ],
        out_specs=(
            pl.BlockSpec((rows, 128), lambda n, m: (n, 0)),  # per-tile loss sum
            pl.BlockSpec((rows, 128), lambda n, m: (n, 0)),  # per-tile valid cnt
        ),
        compiler_params=pltpu.CompilerParams(
            dimension_semantics=("parallel", "arbitrary"),
            vmem_limit_bytes=32 * 1024 * 1024),
    )(ps_flat, pts3d_r, normm_r, valid_r)

    # Final cross-lane reduction + mean in plain JAX (N elements, negligible).
    return (jnp.sum(num) / jnp.sum(den)).astype(jnp.float32)


def esfm_loss_ref(Ps, pts3D, norm_M, valid_pts):
    """Pure-JAX reference (mirrors the PyTorch forward)."""
    pts_2d = jnp.einsum('mij,jn->min', Ps, pts3D,
                        precision=jax.lax.Precision.HIGHEST)
    w = pts_2d[:, 2, :]
    if HINGE_LOSS:
        projected = w > INFINITY_PTS_MARGIN
    else:
        projected = jnp.abs(w) > INFINITY_PTS_MARGIN
    hinge = (INFINITY_PTS_MARGIN - w) * HINGE_LOSS_WEIGHT
    denom = jnp.where(projected, w, 1.0)[:, None, :]
    pts_n = pts_2d / denom
    reproj = jnp.linalg.norm(
        pts_n[:, 0:2, :] - norm_M.reshape(Ps.shape[0], 2, -1), axis=1)
    per_pt = jnp.where(projected, reproj, hinge)
    v = valid_pts.astype(jnp.float32)
    return jnp.sum(per_pt * v) / jnp.sum(v)


if __name__ == "__main__":
    key = jax.random.PRNGKey(0)

    # Test 1: small, vreg-aligned point count.
    M, N = 4, 4096
    k1, k2, k3, k4, k5 = jax.random.split(key, 5)
    Ps = jax.random.normal(k1, (M, 3, 4), dtype=jnp.float32)
    pts3D = jax.random.normal(k2, (4, N), dtype=jnp.float32)
    pts3D = pts3D.at[3, :].set(1.0)  # homogeneous coordinate
    norm_M = 0.1 * jax.random.normal(k3, (M, 2, N), dtype=jnp.float32)
    valid_pts = jax.random.bernoulli(k4, 0.8, (M, N))

    out = jax.block_until_ready(esfm_loss_pallas(Ps, pts3D, norm_M, valid_pts))
    ref = esfm_loss_ref(Ps, pts3D, norm_M, valid_pts)
    assert jnp.allclose(out, ref, rtol=1e-4, atol=1e-5), (out, ref)

    # Test 2: non-aligned point count (exercises the padding path).
    M2, N2 = 3, 1000
    ka, kb, kc, kd = jax.random.split(k5, 4)
    Ps2 = jax.random.normal(ka, (M2, 3, 4), dtype=jnp.float32)
    pts3D2 = jax.random.normal(kb, (4, N2), dtype=jnp.float32)
    pts3D2 = pts3D2.at[3, :].set(1.0)
    norm_M2 = 0.1 * jax.random.normal(kc, (M2, 2, N2), dtype=jnp.float32)
    valid_pts2 = jax.random.bernoulli(kd, 0.7, (M2, N2))

    out2 = jax.block_until_ready(
        esfm_loss_pallas(Ps2, pts3D2, norm_M2, valid_pts2))
    ref2 = esfm_loss_ref(Ps2, pts3D2, norm_M2, valid_pts2)
    assert jnp.allclose(out2, ref2, rtol=1e-4, atol=1e-5), (out2, ref2)

    print("KERNEL_OK")
</pallas_src>

<mosaic_0001>
module attributes {stable_mosaic.version = 11 : i64} {
  func.func @_esfm_kernel(%arg0: i32, %arg1: i32, %arg2: memref<48xf32, #tpu.memory_space<smem>>, %arg3: memref<4x32x128xf32, #tpu.memory_space<vmem>>, %arg4: memref<1x2x32x128xf32, #tpu.memory_space<vmem>>, %arg5: memref<1x32x128xf32, #tpu.memory_space<vmem>>, %arg6: memref<32x128xf32, #tpu.memory_space<vmem>>, %arg7: memref<32x128xf32, #tpu.memory_space<vmem>>) attributes {dimension_semantics = [#tpu.dimension_semantics<parallel>, #tpu.dimension_semantics<arbitrary>], iteration_bounds = array<i64: 1, 4>, scalar_prefetch = 0 : i64, scratch_operands = 0 : i64, tpu.core_type = #tpu.core_type<tc>, window_params = [{transform_indices = @transform_0, window_bounds = array<i64: 48>}, {transform_indices = @transform_1, window_bounds = array<i64: 4, 32, 128>}, {transform_indices = @transform_2, window_bounds = array<i64: 1, 2, 32, 128>}, {transform_indices = @transform_3, window_bounds = array<i64: 1, 32, 128>}, {transform_indices = @transform_4, window_bounds = array<i64: 32, 128>}, {transform_indices = @transform_5, window_bounds = array<i64: 32, 128>}]} {
    %c0_i32 = arith.constant 0 : i32
    %0 = arith.cmpi eq, %arg1, %c0_i32 : i32
    %1 = arith.extui %0 : i1 to i32
    %c0_i32_0 = arith.constant 0 : i32
    %2 = arith.cmpi ne, %1, %c0_i32_0 : i32
    scf.if %2 {
      %cst_50 = arith.constant 0.000000e+00 : f32
      %124 = vector.broadcast %cst_50 : f32 to vector<32x128xf32>
      %c0_51 = arith.constant 0 : index
      %c0_52 = arith.constant 0 : index
      %125 = vector.load %arg6[%c0_51, %c0_52] : memref<32x128xf32, #tpu.memory_space<vmem>>, vector<32x128xf32>
      tpu.vector_store %arg6[%c0_51, %c0_52], %124 {strides = array<i32>} : memref<32x128xf32, #tpu.memory_space<vmem>>, vector<32x128xf32>,
      %cst_53 = arith.constant 0.000000e+00 : f32
      %126 = vector.broadcast %cst_53 : f32 to vector<32x128xf32>
      %c0_54 = arith.constant 0 : index
      %c0_55 = arith.constant 0 : index
      %127 = vector.load %arg7[%c0_54, %c0_55] : memref<32x128xf32, #tpu.memory_space<vmem>>, vector<32x128xf32>
      tpu.vector_store %arg7[%c0_54, %c0_55], %126 {strides = array<i32>} : memref<32x128xf32, #tpu.memory_space<vmem>>, vector<32x128xf32>,
    } else {
    }
    %c0 = arith.constant 0 : index
    %c0_1 = arith.constant 0 : index
    %c0_2 = arith.constant 0 : index
    %3 = vector.load %arg3[%c0, %c0_1, %c0_2] : memref<4x32x128xf32, #tpu.memory_space<vmem>>, vector<1x32x128xf32>
    %4 = vector.shape_cast %3 : vector<1x32x128xf32> to vector<32x128xf32>
    %c1 = arith.constant 1 : index
    %c0_3 = arith.constant 0 : index
    %c0_4 = arith.constant 0 : index
    %5 = vector.load %arg3[%c1, %c0_3, %c0_4] : memref<4x32x128xf32, #tpu.memory_space<vmem>>, vector<1x32x128xf32>
    %6 = vector.shape_cast %5 : vector<1x32x128xf32> to vector<32x128xf32>
    %c2 = arith.constant 2 : index
    %c0_5 = arith.constant 0 : index
    %c0_6 = arith.constant 0 : index
    %7 = vector.load %arg3[%c2, %c0_5, %c0_6] : memref<4x32x128xf32, #tpu.memory_space<vmem>>, vector<1x32x128xf32>
    %8 = vector.shape_cast %7 : vector<1x32x128xf32> to vector<32x128xf32>
    %c3 = arith.constant 3 : index
    %c0_7 = arith.constant 0 : index
    %c0_8 = arith.constant 0 : index
    %9 = vector.load %arg3[%c3, %c0_7, %c0_8] : memref<4x32x128xf32, #tpu.memory_space<vmem>>, vector<1x32x128xf32>
    %10 = vector.shape_cast %9 : vector<1x32x128xf32> to vector<32x128xf32>
    %c12_i32 = arith.constant 12 : i32
    %11 = arith.muli %arg1, %c12_i32 : i32
    %c0_i32_9 = arith.constant 0 : i32
    %12 = arith.addi %11, %c0_i32_9 : i32
    %c0_i32_10 = arith.constant 0 : i32
    %13 = arith.addi %12, %c0_i32_10 : i32
    %14 = arith.index_cast %13 : i32 to index
    %15 = memref.load %arg2[%14] : memref<48xf32, #tpu.memory_space<smem>>
    %16 = vector.broadcast %15 : f32 to vector<32x128xf32>
    %17 = arith.mulf %16, %4 : vector<32x128xf32>
    %c0_i32_11 = arith.constant 0 : i32
    %18 = arith.addi %11, %c0_i32_11 : i32
    %c1_i32 = arith.constant 1 : i32
    %19 = arith.addi %18, %c1_i32 : i32
    %20 = arith.index_cast %19 : i32 to index
    %21 = memref.load %arg2[%20] : memref<48xf32, #tpu.memory_space<smem>>
    %22 = vector.broadcast %21 : f32 to vector<32x128xf32>
    %23 = arith.mulf %22, %6 : vector<32x128xf32>
    %24 = arith.addf %17, %23 : vector<32x128xf32>
    %c0_i32_12 = arith.constant 0 : i32
    %25 = arith.addi %11, %c0_i32_12 : i32
    %c2_i32 = arith.constant 2 : i32
    %26 = arith.addi %25, %c2_i32 : i32
    %27 = arith.index_cast %26 : i32 to index
    %28 = memref.load %arg2[%27] : memref<48xf32, #tpu.memory_space<smem>>
    %29 = vector.broadcast %28 : f32 to vector<32x128xf32>
    %30 = arith.mulf %29, %8 : vector<32x128xf32>
    %31 = arith.addf %24, %30 : vector<32x128xf32>
    %c0_i32_13 = arith.constant 0 : i32
    %32 = arith.addi %11, %c0_i32_13 : i32
    %c3_i32 = arith.constant 3 : i32
    %33 = arith.addi %32, %c3_i32 : i32
    %34 = arith.index_cast %33 : i32 to index
    %35 = memref.load %arg2[%34] : memref<48xf32, #tpu.memory_space<smem>>
    %36 = vector.broadcast %35 : f32 to vector<32x128xf32>
    %37 = arith.mulf %36, %10 : vector<32x128xf32>
    %38 = arith.addf %31, %37 : vector<32x128xf32>
    %c4_i32 = arith.constant 4 : i32
    %39 = arith.addi %11, %c4_i32 : i32
    %c0_i32_14 = arith.constant 0 : i32
    %40 = arith.addi %39, %c0_i32_14 : i32
    %41 = arith.index_cast %40 : i32 to index
    %42 = memref.load %arg2[%41] : memref<48xf32, #tpu.memory_space<smem>>
    %43 = vector.broadcast %42 : f32 to vector<32x128xf32>
    %44 = arith.mulf %43, %4 : vector<32x128xf32>
    %c4_i32_15 = arith.constant 4 : i32
    %45 = arith.addi %11, %c4_i32_15 : i32
    %c1_i32_16 = arith.constant 1 : i32
    %46 = arith.addi %45, %c1_i32_16 : i32
    %47 = arith.index_cast %46 : i32 to index
    %48 = memref.load %arg2[%47] : memref<48xf32, #tpu.memory_space<smem>>
    %49 = vector.broadcast %48 : f32 to vector<32x128xf32>
    %50 = arith.mulf %49, %6 : vector<32x128xf32>
    %51 = arith.addf %44, %50 : vector<32x128xf32>
    %c4_i32_17 = arith.constant 4 : i32
    %52 = arith.addi %11, %c4_i32_17 : i32
    %c2_i32_18 = arith.constant 2 : i32
    %53 = arith.addi %52, %c2_i32_18 : i32
    %54 = arith.index_cast %53 : i32 to index
    %55 = memref.load %arg2[%54] : memref<48xf32, #tpu.memory_space<smem>>
    %56 = vector.broadcast %55 : f32 to vector<32x128xf32>
    %57 = arith.mulf %56, %8 : vector<32x128xf32>
    %58 = arith.addf %51, %57 : vector<32x128xf32>
    %c4_i32_19 = arith.constant 4 : i32
    %59 = arith.addi %11, %c4_i32_19 : i32
    %c3_i32_20 = arith.constant 3 : i32
    %60 = arith.addi %59, %c3_i32_20 : i32
    %61 = arith.index_cast %60 : i32 to index
    %62 = memref.load %arg2[%61] : memref<48xf32, #tpu.memory_space<smem>>
    %63 = vector.broadcast %62 : f32 to vector<32x128xf32>
    %64 = arith.mulf %63, %10 : vector<32x128xf32>
    %65 = arith.addf %58, %64 : vector<32x128xf32>
    %c8_i32 = arith.constant 8 : i32
    %66 = arith.addi %11, %c8_i32 : i32
    %c0_i32_21 = arith.constant 0 : i32
    %67 = arith.addi %66, %c0_i32_21 : i32
    %68 = arith.index_cast %67 : i32 to index
    %69 = memref.load %arg2[%68] : memref<48xf32, #tpu.memory_space<smem>>
    %70 = vector.broadcast %69 : f32 to vector<32x128xf32>
    %71 = arith.mulf %70, %4 : vector<32x128xf32>
    %c8_i32_22 = arith.constant 8 : i32
    %72 = arith.addi %11, %c8_i32_22 : i32
    %c1_i32_23 = arith.constant 1 : i32
    %73 = arith.addi %72, %c1_i32_23 : i32
    %74 = arith.index_cast %73 : i32 to index
    %75 = memref.load %arg2[%74] : memref<48xf32, #tpu.memory_space<smem>>
    %76 = vector.broadcast %75 : f32 to vector<32x128xf32>
    %77 = arith.mulf %76, %6 : vector<32x128xf32>
    %78 = arith.addf %71, %77 : vector<32x128xf32>
    %c8_i32_24 = arith.constant 8 : i32
    %79 = arith.addi %11, %c8_i32_24 : i32
    %c2_i32_25 = arith.constant 2 : i32
    %80 = arith.addi %79, %c2_i32_25 : i32
    %81 = arith.index_cast %80 : i32 to index
    %82 = memref.load %arg2[%81] : memref<48xf32, #tpu.memory_space<smem>>
    %83 = vector.broadcast %82 : f32 to vector<32x128xf32>
    %84 = arith.mulf %83, %8 : vector<32x128xf32>
    %85 = arith.addf %78, %84 : vector<32x128xf32>
    %c8_i32_26 = arith.constant 8 : i32
    %86 = arith.addi %11, %c8_i32_26 : i32
    %c3_i32_27 = arith.constant 3 : i32
    %87 = arith.addi %86, %c3_i32_27 : i32
    %88 = arith.index_cast %87 : i32 to index
    %89 = memref.load %arg2[%88] : memref<48xf32, #tpu.memory_space<smem>>
    %90 = vector.broadcast %89 : f32 to vector<32x128xf32>
    %91 = arith.mulf %90, %10 : vector<32x128xf32>
    %92 = arith.addf %85, %91 : vector<32x128xf32>
    %cst = arith.constant 9.99999974E-5 : f32
    %93 = vector.broadcast %cst : f32 to vector<32x128xf32>
    %94 = arith.cmpf ogt, %92, %93 : vector<32x128xf32>
    %cst_28 = arith.constant 9.99999974E-5 : f32
    %95 = vector.broadcast %cst_28 : f32 to vector<32x128xf32>
    %96 = arith.subf %95, %92 : vector<32x128xf32>
    %cst_29 = arith.constant 1.000000e+00 : f32
    %97 = vector.broadcast %cst_29 : f32 to vector<32x128xf32>
    %98 = arith.mulf %96, %97 : vector<32x128xf32>
    %cst_30 = arith.constant 1.000000e+00 : f32
    %99 = vector.broadcast %cst_30 : f32 to vector<32x128xf32>
    %100 = arith.select %94, %92, %99 : vector<32x128xi1>, vector<32x128xf32>
    %101 = tpu.reciprocal %100 : vector<32x128xf32> -> vector<32x128xf32>
    %102 = arith.mulf %38, %101 : vector<32x128xf32>
    %c0_31 = arith.constant 0 : index
    %c0_32 = arith.constant 0 : index
    %c0_33 = arith.constant 0 : index
    %c0_34 = arith.constant 0 : index
    %103 = vector.load %arg4[%c0_31, %c0_32, %c0_33, %c0_34] : memref<1x2x32x128xf32, #tpu.memory_space<vmem>>, vector<1x1x32x128xf32>
    %104 = vector.shape_cast %103 : vector<1x1x32x128xf32> to vector<32x128xf32>
    %105 = arith.subf %102, %104 : vector<32x128xf32>
    %106 = arith.mulf %65, %101 : vector<32x128xf32>
    %c0_35 = arith.constant 0 : index
    %c1_36 = arith.constant 1 : index
    %c0_37 = arith.constant 0 : index
    %c0_38 = arith.constant 0 : index
    %107 = vector.load %arg4[%c0_35, %c1_36, %c0_37, %c0_38] : memref<1x2x32x128xf32, #tpu.memory_space<vmem>>, vector<1x1x32x128xf32>
    %108 = vector.shape_cast %107 : vector<1x1x32x128xf32> to vector<32x128xf32>
    %109 = arith.subf %106, %108 : vector<32x128xf32>
    %110 = arith.mulf %105, %105 : vector<32x128xf32>
    %111 = arith.mulf %109, %109 : vector<32x128xf32>
    %112 = arith.addf %110, %111 : vector<32x128xf32>
    %113 = math.sqrt %112 : vector<32x128xf32>
    %114 = arith.select %94, %113, %98 : vector<32x128xi1>, vector<32x128xf32>
    %c0_39 = arith.constant 0 : index
    %c0_40 = arith.constant 0 : index
    %c0_41 = arith.constant 0 : index
    %115 = vector.load %arg5[%c0_39, %c0_40, %c0_41] : memref<1x32x128xf32, #tpu.memory_space<vmem>>, vector<1x32x128xf32>
    %116 = vector.shape_cast %115 : vector<1x32x128xf32> to vector<32x128xf32>
    %c0_42 = arith.constant 0 : index
    %c0_43 = arith.constant 0 : index
    %117 = vector.load %arg6[%c0_42, %c0_43] : memref<32x128xf32, #tpu.memory_space<vmem>>, vector<32x128xf32>
    %118 = arith.mulf %114, %116 : vector<32x128xf32>
    %119 = arith.addf %117, %118 : vector<32x128xf32>
    %c0_44 = arith.constant 0 : index
    %c0_45 = arith.constant 0 : index
    %120 = vector.load %arg6[%c0_44, %c0_45] : memref<32x128xf32, #tpu.memory_space<vmem>>, vector<32x128xf32>
    tpu.vector_store %arg6[%c0_44, %c0_45], %119 {strides = array<i32>} : memref<32x128xf32, #tpu.memory_space<vmem>>, vector<32x128xf32>,
    %c0_46 = arith.constant 0 : index
    %c0_47 = arith.constant 0 : index
    %121 = vector.load %arg7[%c0_46, %c0_47] : memref<32x128xf32, #tpu.memory_space<vmem>>, vector<32x128xf32>
    %122 = arith.addf %121, %116 : vector<32x128xf32>
    %c0_48 = arith.constant 0 : index
    %c0_49 = arith.constant 0 : index
    %123 = vector.load %arg7[%c0_48, %c0_49] : memref<32x128xf32, #tpu.memory_space<vmem>>, vector<32x128xf32>
    tpu.vector_store %arg7[%c0_48, %c0_49], %122 {strides = array<i32>} : memref<32x128xf32, #tpu.memory_space<vmem>>, vector<32x128xf32>,
    return
  }
  func.func @transform_0(%arg0: i32, %arg1: i32) -> i32 {
    %c0_i32 = arith.constant 0 : i32
    %c0_i32_0 = arith.constant 0 : i32
    return %c0_i32 : i32
  }
  func.func @transform_1(%arg0: i32, %arg1: i32) -> (i32, i32, i32) {
    %c0_i32 = arith.constant 0 : i32
    %c0_i32_0 = arith.constant 0 : i32
    %c0_i32_1 = arith.constant 0 : i32
    return %c0_i32, %arg0, %c0_i32_0 : i32, i32, i32
  }
  func.func @transform_2(%arg0: i32, %arg1: i32) -> (i32, i32, i32, i32) {
    %c0_i32 = arith.constant 0 : i32
    %c0_i32_0 = arith.constant 0 : i32
    %c0_i32_1 = arith.constant 0 : i32
    return %arg1, %c0_i32, %arg0, %c0_i32_0 : i32, i32, i32, i32
  }
  func.func @transform_3(%arg0: i32, %arg1: i32) -> (i32, i32, i32) {
    %c0_i32 = arith.constant 0 : i32
    %c0_i32_0 = arith.constant 0 : i32
    return %arg1, %arg0, %c0_i32 : i32, i32, i32
  }
  func.func @transform_4(%arg0: i32, %arg1: i32) -> (i32, i32) {
    %c0_i32 = arith.constant 0 : i32
    %c0_i32_0 = arith.constant 0 : i32
    return %arg0, %c0_i32 : i32, i32
  }
  func.func @transform_5(%arg0: i32, %arg1: i32) -> (i32, i32) {
    %c0_i32 = arith.constant 0 : i32
    %c0_i32_0 = arith.constant 0 : i32
    return %arg0, %c0_i32 : i32, i32
  }
}

</mosaic_0001>

<bundles_post_ra>
// kernel: tpu_custom_call.1
= control target key start
LH: loop header
LB: loop body
LE: loop exit
PB: predicated region body
PF: predicated region fallthrough
CT: control target
= control target key end

     0   :  { %s1683_s0 = inlined_call_operand.hbm [shape: f32[48], index: 0, kind: input, shape index: {}]   ;;  %s1684_s1 = inlined_call_operand.hbm [shape: f32[4,32,128], index: 1, kind: input, shape index: {}]   ;;  %s1685_s2 = inlined_call_operand.hbm [shape: f32[4,2,32,128], index: 2, kind: input, shape index: {}]   ;;  %s1686_s3 = inlined_call_operand.hbm [shape: f32[4,32,128], index: 3, kind: input, shape index: {}]   ;;  %s1687_s4 = inlined_call_operand.hbm [shape: f32[32,128], index: 4, kind: output, shape index: {0}]   ;;  %s1688_s5 = inlined_call_operand.hbm [shape: f32[32,128], index: 5, kind: output, shape index: {1}]  }
   0x1   :  { %1692 = sst [smem:[#allocation18_spill]] %s1683_s0 }
   0x2   :  { %1693 = sst [smem:[#allocation19_spill]] %s1684_s1 }
   0x3   :  { %1694 = sst [smem:[#allocation20_spill]] %s1685_s2 }
   0x4   :  { %1695 = sst [smem:[#allocation21_spill]] %s1686_s3 }
   0x5   :  { %11 = vsyncpa [#allocation5], 0 }
   0x6   :  { %12 = vsyncpa [#allocation3], 0 }
   0x7   :  { %13 = vsyncpa [#allocation8], 0 }
   0x8   :  { %15 = vsyncpa [#allocation8 + $0x1], 0 }
   0x9   :  { %16 = vsyncpa [#allocation4], 0 }
   0xa   :  { %17 = vsyncpa [#allocation12], 0  ;;  %s1166_s18 = smov 0   ;;  %s1168_s19 = smov 0  }
   0xb   :  { %s1170_s20 = smov 0   ;;  %s1172_s21 = smov 0  }
   0xc   :  { %s1174_s22 = smov 0   ;;  %s1176_s23 = smov 0  }
   0xd LB: > { %s32_s24 = sadd.s32 1, %s1119_s22  ;;  %s91_s25 = sadd.s32 1, %s1111_s20  ;;  %s1123_s23 = sphi %s1176_s23, %s23_s23   ;;  %s1119_s22 = sphi %s1174_s22, %s1715_s22   ;;  %s1115_s21 = sphi %s1172_s21, %s1714_s21   ;;  %s1111_s20 = sphi %s1170_s20, %s1713_s20   ;;  %s1107_s19 = sphi %s1168_s19, %s1712_s19   ;;  %s1103_s18 = sphi %s1166_s18, %s1711_s18  }
   0xe   : > { %p33_p0 = scmp.ge.s32.totalorder %s32_s24, 4  ;;  %p98_p1 = scmp.ne.s32.totalorder %s1111_s20, %s1107_s19 }
   0xf   : > { %p99_p2 = scmp.eq.s32.totalorder %s1123_s23, 0  ;;  %p824_p5 = scmp.lt.s32.totalorder %s1123_s23, 4 }
  0x10   : > { %s1717_s24 = smov (%p33_p0, %s32_s24), 0  ;;  %s233_s28 = sand.u32 1, %s1123_s23  }
  0x11   : > { %p1203_p3 = por %p99_p2, %p98_p1  ;;  %s86_s27 = ssub.s32 %s1119_s22, %s1717_s24 }
  0x12   : > { %p89_p4 = scmp.eq.s32.totalorder %s86_s27, 0  ;;  %s235_s29 = sand.u32 1, %s1111_s20  }
  0x13   : > { %s764_s6 = sshll.u32 %s235_s29, 6  ;;  %s786_s7 = sshll.u32 %s1119_s22, 10 }
  0x14   : > { %s1213_s30 = scalar_select %p89_p4, %s1111_s20, %s91_s25  }
  0x15   : > { %s1697_s2 = sld [smem:[#allocation20_spill]]  ;;  %s237_s11 = scalar_lea.vmem [#allocation7], %s764_s6 }
  0x16   : > { %s246_s12 = sshll.u32 %s237_s11, 4  ;;  %p1225_p6 = pnand %p824_p5, %p1203_p3  ;;  %s1221_s12 = int_to_ptr.vmem [resolvable:$true] %s246_s12 }
  0x17   : > { %s1229_s14 = sshll.u32 %s235_s29, 5  ;;  %s1231_s15 = scalar_lea.sflag [#allocation8], %s233_s28 }
  0x18   : > { %p906_p8 = pneg %p1225_p6 }
  0x1b   : > { %s1219_s10 = scalar_lea.hbm %s1697_s2, %s786_s7  ;;  %s909_s26 = scalar_lea.hbm %s1697_s2, 4096 }
  0x1c   : > { %s904_s16 = scalar_lea.hbm %s1219_s10, 1024  ;;  %p910_p11 = scmp.lt.u32.totalorder %s1219_s10, %s1697_s2 }
  0x1d   : > { %p905_p7 = scmp.ne.s32.totalorder %s1219_s10, %s904_s16  ;;  %p911_p12 = scmp.lt.u32.totalorder %s909_s26, %s904_s16 }
  0x1e   : > { %p913_p0 = scmp.lt.u32.totalorder %s904_s16, %s1219_s10 }
  0x1f   : > { %p907_p9 = pnand %p906_p8, %p905_p7  ;;  %p912_p13 = por %p911_p12, %p910_p11 }
  0x21   : > { %p908_p10 = pneg %p907_p9  ;;  %p914_p1 = por %p913_p0, %p912_p13 }
  0x23   : > { %p915_p2 = pnand %p914_p1, %p908_p10 }
  0x25   : > { %918 = shalt.err (!%p915_p2)
}
  0x26   : > { %s919_s28 = scalar_lea.vmem %s1221_s12, 1024  ;;  %s1125_s29 = smov [#allocation7]  }
  0x27   : > { %p920_p3 = scmp.ne.s32.totalorder %s1221_s12, %s919_s28  ;;  %s924_s7 = sshll.u32 %s1125_s29, 4  ;;  %s925_s7 = int_to_ptr.vmem [resolvable:$false] %s924_s7 }
  0x28   : > { %s926_s8 = scalar_lea.vmem %s925_s7, 2048  ;;  %p927_p7 = scmp.lt.s32.totalorder %s1221_s12, %s925_s7 }
  0x29   : > { %p922_p4 = pnand %p920_p3, %p906_p8  ;;  %p928_p9 = scmp.lt.s32.totalorder %s926_s8, %s919_s28 }
  0x2b   : > { %p923_p5 = pneg %p922_p4  ;;  %p929_p11 = por %p928_p9, %p927_p7 }
  0x2d   : > { %p930_p12 = pnand %p929_p11, %p923_p5 }
  0x2f   : > { %933 = shalt.err (!%p930_p12)
}
  0x30   : > { %s1126_s9 = smov 128   ;;  %s1127_s11 = smov 8  }
  0x31   : > { %818 = dma.hbm_to_vmem [thread:$0]  (!%p1225_p6), %s1219_s10, 1024, %s1221_s12, %s1231_s15, %s1126_s9, %s1126_s9, %s1127_s11  }
  0x32   : > { %s1263_s16 = sadd.s32 4294967295, %s1123_s23   ;;  %p104_p10 = scmp.ne.s32.totalorder %s1107_s19, %s1103_s18 }
  0x33   : > { %p1689_p13 = scmp.eq.s32.totalorder %s1263_s16, 0  ;;  %p760_p0 = scmp.ge.s32.totalorder %s1123_s23, 1 }
  0x34   : > { %p195_p1 = scmp.lt.s32.totalorder %s1123_s23, 5  ;;  %s260_s17 = scalar_lea.vmem [#allocation9], %s1229_s14 }
  0x35   : > { %s269_s25 = sshll.u32 %s260_s17, 4  ;;  %p1273_p2 = por %p1689_p13, %p104_p10  ;;  %s1289_s25 = int_to_ptr.vmem [resolvable:$true] %s269_s25 }
  0x36   : > { %p1277_p3 = pnand %p760_p0, %p195_p1  ;;  %s1128_s10 = smov [#allocation6]  }
  0x37   : > { %s1699_s26 = scalar_select %p1273_p2, 1, 0 }
  0x38   : > { %s1700_s27 = scalar_select %p1277_p3, 1, 0 }
  0x39   : > { %s219_s12 = sshll.u32 %s1128_s10, 4  ;;  %s787_s6 = sshll.u32 %s1119_s22, 9  ;;  %s1297_s12 = int_to_ptr.vmem [resolvable:$true] %s219_s12 }
  0x3a   : > { %p808_p4 = pneg %p1277_p3  ;;  %s1701_s3 = sld [smem:[#allocation21_spill]] }
  0x3c   : > { %p1293_p5 = pnand %p808_p4, %p1689_p13 }
  0x40   : > { %s1287_s14 = scalar_lea.hbm %s1701_s3, %s787_s6  ;;  %s939_s10 = scalar_lea.hbm %s1701_s3, 2048 }
  0x41   : > { %s934_s7 = scalar_lea.hbm %s1287_s14, 512  ;;  %p940_p12 = scmp.lt.u32.totalorder %s1287_s14, %s1701_s3 }
  0x42   : > { %p935_p7 = scmp.ne.s32.totalorder %s1287_s14, %s934_s7  ;;  %p941_p10 = scmp.lt.u32.totalorder %s939_s10, %s934_s7 }
  0x43   : > { %p943_p1 = scmp.lt.u32.totalorder %s934_s7, %s1287_s14 }
  0x44   : > { %p937_p9 = pnand %p935_p7, %p906_p8  ;;  %p942_p0 = por %p941_p10, %p940_p12 }
  0x46   : > { %p938_p11 = pneg %p937_p9  ;;  %p944_p4 = por %p943_p1, %p942_p0 }
  0x48   : > { %p945_p13 = pnand %p944_p4, %p938_p11 }
  0x4a   : > { %948 = shalt.err (!%p945_p13)
}
  0x4b   : > { %s949_s28 = scalar_lea.vmem %s1289_s25, 512  ;;  %s1129_s8 = smov [#allocation9]  }
  0x4c   : > { %p950_p7 = scmp.ne.s32.totalorder %s1289_s25, %s949_s28  ;;  %s954_s17 = sshll.u32 %s1129_s8, 4  ;;  %s955_s17 = int_to_ptr.vmem [resolvable:$false] %s954_s17 }
  0x4d   : > { %s956_s6 = scalar_lea.vmem %s955_s17, 1024  ;;  %p957_p3 = scmp.lt.s32.totalorder %s1289_s25, %s955_s17 }
  0x4e   : > { %p952_p9 = pnand %p950_p7, %p906_p8  ;;  %p958_p12 = scmp.lt.s32.totalorder %s956_s6, %s949_s28 }
  0x50   : > { %p953_p2 = pneg %p952_p9  ;;  %p959_p10 = por %p958_p12, %p957_p3 }
  0x52   : > { %p960_p0 = pnand %p959_p10, %p953_p2 }
  0x54   : > { %963 = shalt.err (!%p960_p0)
}
  0x55   : > { %821 = dma.hbm_to_vmem [thread:$0]  (!%p1225_p6), %s1287_s14, 512, %s1289_s25, %s1231_s15, %s1126_s9, %s1126_s9, %s1127_s11  }
  0x56   : > { %s1703_s0 = sld [smem:[#allocation18_spill]]  ;;  %p966_p13 = pneg %p1293_p5 }
  0x5c   : > { %s964_s18 = scalar_lea.hbm %s1703_s0, 16 }
  0x5d   : > { %p965_p8 = scmp.ne.s32.totalorder %s1703_s0, %s964_s18  ;;  %p971_p11 = scmp.lt.u32.totalorder %s964_s18, %s1703_s0 }
  0x5f   : > { %p967_p2 = pnand %p966_p13, %p965_p8 }
  0x61   : > { %p968_p3 = pneg %p967_p2 }
  0x63   : > { %p973_p1 = pnand %p971_p11, %p968_p3 }
  0x65   : > { %976 = shalt.err (!%p973_p1)
}
  0x66   : > { %s1130_s15 = smov [#allocation2]   ;;  %s1704_s1 = sld [smem:[#allocation19_spill]] }
  0x67   : > { %811 = dma.hbm_to_smem (!%p1293_p5), %s1703_s0, 16, %s1130_s15, [#allocation5]  }
  0x6c   : > { %s977_s10 = scalar_lea.hbm %s1704_s1, 2048 }
  0x6d   : > { %p978_p6 = scmp.ne.s32.totalorder %s1704_s1, %s977_s10  ;;  %p984_p9 = scmp.lt.u32.totalorder %s977_s10, %s1704_s1 }
  0x6f   : > { %p980_p4 = pnand %p978_p6, %p966_p13 }
  0x71   : > { %p981_p7 = pneg %p980_p4 }
  0x73   : > { %p986_p12 = pnand %p984_p9, %p981_p7 }
  0x75   : > { %989 = shalt.err (!%p986_p12)
}
  0x76   : > { %s990_s17 = scalar_lea.vmem %s1297_s12, 2048  ;;  %p998_p2 = scmp.lt.s32.totalorder %s1297_s12, %s1297_s12 }
  0x77   : > { %p991_p10 = scmp.ne.s32.totalorder %s1297_s12, %s990_s17  ;;  %p999_p3 = scmp.lt.s32.totalorder %s990_s17, %s990_s17 }
  0x79   : > { %p993_p0 = pnand %p991_p10, %p966_p13  ;;  %p1000_p11 = por %p999_p3, %p998_p2 }
  0x7b   : > { %p994_p8 = pneg %p993_p0 }
  0x7d   : > { %p1001_p1 = pnand %p1000_p11, %p994_p8 }
  0x7f   : > { %1004 = shalt.err (!%p1001_p1)
}
  0x80   : > { %814 = dma.hbm_to_vmem [thread:$0]  (!%p1293_p5), %s1704_s1, 2048, %s1297_s12, [#allocation3], %s1126_s9, %s1126_s9, %s1127_s11  }
  0x81   : > { %p1705_p6 = scmp.ne.s32.totalorder %s1700_s27, 0 }
  0x82   : > { %p1706_p13 = scmp.eq.s32.totalorder (!%p1705_p6), %s1263_s16, 0 }
  0x83   : > { %281 = sbr.rel (%p1705_p6) target bundleno = 270 (0x10e), region = 36 }
  0x8a   : > { %1082 = dma.done.wait (%p1706_p13), [#allocation5], 16   ;;  %p1707_p4 = pmov %p1706_p13 }
  0x8c   : > { %1084 = vsyncadd (%p1707_p4), [#allocation5], 4294967280  ;;  %p1708_p7 = pmov %p1707_p4 }
  0x8d   : > { %p1709_p9 = pmov %p1707_p4 }
  0x8e   : > { %1086 = dma.done.wait (%p1708_p7), [#allocation3], 2048  }
  0x8f   : > { %1088 = vsyncadd (%p1709_p9), [#allocation3], 4294965248  ;;  %s291_s29 = sand.u32 1, %s1263_s16   ;;  %s293_s9 = sand.u32 1, %s1107_s19  }
  0x90   : > { %s773_s11 = sshll.u32 %s293_s9, 6  ;;  %s292_s27 = scalar_lea.sflag [#allocation8], %s291_s29 }
  0x91   : > { %s1385_s12 = scalar_lea.vmem [#allocation7], %s773_s11  ;;  %p1710_p5 = scmp.ne.s32.totalorder %s1699_s26, 0 }
  0x93   : > { %1090 = dma.done.wait (%p1710_p5), %s292_s27, 1536  }
  0x94   : > { %1092 = vsyncadd (%p1710_p5), %s292_s27, 4294965760  ;;  %s774_s14 = sshll.u32 %s293_s9, 5 }
  0x95   : > { %s1391_s6 = scalar_lea.vmem [#allocation9], %s774_s14 }
  0x96   : > { %309 = sfence }
  0x97   : > { %p775_p12 = scmp.ne.s32.totalorder %s1115_s21, 0 }
  0x98   : > { %v1131_v0 = vmov (!%p775_p12), 0.0  }
  0x99   : > { %340 = sbr.rel (%p775_p12) target bundleno = 160 (0xa0), region = 56  ;;  %341 = vst [vmem:[#allocation10] sm:$0xff] (!%p775_p12), %v1131_v0  ;;  %342 = vst [vmem:[#allocation10 + $0x8] sm:$0xff] (!%p775_p12), %v1131_v0 }
  0x9a   : > { %343 = vst [vmem:[#allocation10 + $0x10] sm:$0xff] (!%p775_p12), %v1131_v0  ;;  %344 = vst [vmem:[#allocation10 + $0x18] sm:$0xff] (!%p775_p12), %v1131_v0 }
  0x9b   : > { %345 = vst [vmem:[#allocation11] sm:$0xff] (!%p775_p12), %v1131_v0  ;;  %346 = vst [vmem:[#allocation11 + $0x8] sm:$0xff] (!%p775_p12), %v1131_v0 }
  0x9c   : > { %347 = vst [vmem:[#allocation11 + $0x10] sm:$0xff] (!%p775_p12), %v1131_v0  ;;  %348 = vst [vmem:[#allocation11 + $0x18] sm:$0xff] (!%p775_p12), %v1131_v0 }
  0xa0 PF: > { %s1395_s26 = smul.u32 12, %s1115_s21  ;;  %v349_v3 = vld [vmem:[#allocation6] sm:$0xff]  ;;  %v350_v5 = vld [vmem:[#allocation6 + $0x8] sm:$0xff]  ;;  %v1424_v10 = vld [vmem:[#allocation6 + $0x10] sm:$0xff]  ;;  %p827_p10 = scmp.eq.s32.totalorder %s1263_s16, 3 }
  0xa1   : > { %v354_v6 = vld [vmem:[#allocation6 + $0x20] sm:$0xff]  ;;  %v355_v8 = vld [vmem:[#allocation6 + $0x28] sm:$0xff]  ;;  %v356_v15 = vld [vmem:[#allocation6 + $0x30] sm:$0xff] }
  0xa2   : > { %s375_s7 = sadd.s32 1, %s1395_s26  ;;  %s386_s10 = sadd.s32 2, %s1395_s26  ;;  %v359_v11 = vld [vmem:[#allocation6 + $0x40] sm:$0xff]  ;;  %v360_v21 = vld [vmem:[#allocation6 + $0x48] sm:$0xff]  ;;  %v361_v36 = vld [vmem:[#allocation6 + $0x50] sm:$0xff] }
  0xa3   : > { %s369_s8 = sld [smem:[#allocation2 + %s1395_s26]]  ;;  %s397_s28 = sadd.s32 3, %s1395_s26  ;;  %v1434_v17 = vld [vmem:[#allocation6 + $0x60] sm:$0xff]  ;;  %v365_v30 = vld [vmem:[#allocation6 + $0x68] sm:$0xff]  ;;  %v1480_v49 = vld [vmem:[#allocation6 + $0x70] sm:$0xff] }
  0xa4   : > { %s376_s18 = sld [smem:[#allocation2 + %s375_s7]]  ;;  %s408_s13 = sadd.s32 4, %s1395_s26 }
  0xa5   : > { %s387_s17 = sld [smem:[#allocation2 + %s386_s10]]  ;;  %s415_s21 = sadd.s32 5, %s1395_s26 }
  0xa6   : > { %s1403_s15 = sld [smem:[#allocation2 + %s397_s28]]  ;;  %s426_s9 = sadd.s32 6, %s1395_s26 }
  0xa7   : > { %s1405_s25 = sld [smem:[#allocation2 + %s408_s13]]  ;;  %s448_s11 = sadd.s32 8, %s1395_s26 }
  0xa8   : > { %s1407_s29 = sld [smem:[#allocation2 + %s415_s21]]  ;;  %s455_s14 = sadd.s32 9, %s1395_s26 }
  0xa9   : > { %s449_s27 = sld [smem:[#allocation2 + %s448_s11]]  ;;  %s466_s1 = sadd.s32 10, %s1395_s26  ;;  %v1413_v1 = vstv %s369_s8 }
  0xaa   : > { %s456_s0 = sld [smem:[#allocation2 + %s455_s14]]  ;;  %s477_s3 = sadd.s32 11, %s1395_s26  ;;  %v1416_v2 = vstv %s376_s18  ;;  %v371_v7 = vmul.f32 %v1413_v1, %v349_v3  ;;  %v372_v9 = vmul.f32 %v1413_v1, %v350_v5  ;;  %v1432_v16 = vmul.f32 %v1413_v1, %v1424_v10 }
  0xab   : > { %s467_s2 = sld [smem:[#allocation2 + %s466_s1]]  ;;  %v1418_v4 = vstv %s387_s17  ;;  %v378_v12 = vmul.f32 %v1416_v2, %v354_v6  ;;  %v379_v14 = vmul.f32 %v1416_v2, %v355_v8  ;;  %s437_s1 = sadd.s32 7, %s1395_s26  ;;  %v1442_v22 = vmul.f32 %v1416_v2, %v356_v15 }
  0xac   : > { %s478_s7 = sld [smem:[#allocation2 + %s477_s3]]  ;;  %v389_v18 = vmul.f32 %v1418_v4, %v359_v11  ;;  %v1445_v23 = vstv %s1403_s15  ;;  %v390_v26 = vmul.f32 %v1418_v4, %v360_v21  ;;  %v1470_v40 = vmul.f32 %v1418_v4, %v361_v36 }
  0xad   : > { %s1420_s10 = sld [smem:[#allocation2 + %s426_s9]]  ;;  %v1452_v27 = vstv %s1405_s25  ;;  %v382_v37 = vadd.f32 %v378_v12, %v371_v7  ;;  %v400_v38 = vmul.f32 %v1445_v23, %v1434_v17  ;;  %v383_v56 = vadd.f32 %v379_v14, %v372_v9  ;;  %v1511_v12 = vld [vmem:[#allocation6 + $0x38] sm:$0xff] }
  0xae   : > { %v1459_v32 = vstv %s1407_s29  ;;  %v411_v45 = vmul.f32 %v1452_v27, %v349_v3  ;;  %v412_v47 = vmul.f32 %v1452_v27, %v350_v5 }
  0xaf   : > { %v1427_v13 = vstv %s449_s27  ;;  %v418_v46 = vmul.f32 %v1459_v32, %v354_v6  ;;  %v419_v48 = vmul.f32 %v1459_v32, %v355_v8  ;;  %v393_v54 = vadd.f32 %v389_v18, %v382_v37  ;;  %v595_v37 = vld [vmem:[#allocation11 + $0x10] sm:$0xff] }
  0xb0   : > { %v451_v19 = vmul.f32 %v1427_v13, %v349_v3  ;;  %v1439_v20 = vstv %s456_s0  ;;  %v452_v31 = vmul.f32 %v1427_v13, %v350_v5  ;;  %s1461_s0 = sld [smem:[#allocation2 + %s437_s1]]  ;;  %v453_v52 = vmul.f32 %v1427_v13, %v1424_v10 }
  0xb1   : > { %v458_v24 = vmul.f32 %v1439_v20, %v354_v6  ;;  %v1448_v25 = vstv %s467_s2  ;;  %v459_v35 = vmul.f32 %v1439_v20, %v355_v8  ;;  %v460_v53 = vmul.f32 %v1439_v20, %v356_v15  ;;  %s1132_s2 = smov [#allocation11]  }
  0xb2   : > { %v469_v28 = vmul.f32 %v1448_v25, %v359_v11  ;;  %v1455_v29 = vstv %s478_s7  ;;  %v470_v39 = vmul.f32 %v1448_v25, %v360_v21  ;;  %v471_v57 = vmul.f32 %v1448_v25, %v361_v36  ;;  %s630_s3 = sshll.u32 %s1132_s2, 4  ;;  %s1556_s3 = int_to_ptr.vmem [resolvable:$true] %s630_s3 }
  0xb3   : > { %v462_v33 = vadd.f32 %v458_v24, %v451_v19  ;;  %v480_v34 = vmul.f32 %v1455_v29, %v1434_v17  ;;  %v1473_v41 = vstv %s1420_s10  ;;  %v463_v43 = vadd.f32 %v459_v35, %v452_v31  ;;  %v1522_v31 = vld [vmem:[#allocation6 + $0x78] sm:$0xff]  ;;  %p1012_p3 = scmp.lt.s32.totalorder %s1556_s3, %s1556_s3 }
  0xb4   : > { %v481_v44 = vmul.f32 %v1455_v29, %v365_v30  ;;  %v429_v55 = vmul.f32 %v1473_v41, %v359_v11  ;;  %v464_v59 = vadd.f32 %v460_v53, %v453_v52  ;;  %v482_v60 = vmul.f32 %v1455_v29, %v1480_v49  ;;  %v1509_v11 = vld [vmem:[#allocation6 + $0x18] sm:$0xff]  ;;  %v508_v53 = vld [vmem:[%s1385_s12] sm:$0xff] }
  0xb5   : > { %v473_v42 = vadd.f32 %v469_v28, %v462_v33  ;;  %v474_v51 = vadd.f32 %v470_v39, %v463_v43  ;;  %v422_v61 = vadd.f32 %v418_v46, %v411_v45  ;;  %v423_v63 = vadd.f32 %v419_v48, %v412_v47  ;;  %v593_v33 = vld [vmem:[#allocation11] sm:$0xff]  ;;  %v1549_v45 = vld [vmem:[%s1391_s6 + $0x18] sm:$0xff] }
  0xb6   : > { %v430_v0 = vmul.f32 %v1473_v41, %v360_v21  ;;  %v1499_v3 = vstv %s1461_s0  ;;  %v475_v5 = vadd.f32 %v471_v57, %v464_v59  ;;  %v401_v6 = vmul.f32 %v1445_v23, %v365_v30  ;;  %v1517_v21 = vld [vmem:[#allocation6 + $0x58] sm:$0xff] }
  0xb7   : > { %v1482_v50 = vadd.f32 %v480_v34, %v473_v42  ;;  %v1490_v58 = vadd.f32 %v481_v44, %v474_v51  ;;  %v413_v8 = vmul.f32 %v1452_v27, %v1424_v10  ;;  %v420_v9 = vmul.f32 %v1459_v32, %v356_v15  ;;  %v1544_v42 = vld [vmem:[%s1391_s6 + $0x10] sm:$0xff] }
  0xb8   : > { %v1513_v14 = vadd.f32 %v400_v38, %v393_v54  ;;  %v394_v18 = vadd.f32 %v390_v26, %v383_v56  ;;  %v1515_v19 = vadd.f32 %v482_v60, %v475_v5  ;;  %v433_v24 = vadd.f32 %v429_v55, %v422_v61  ;;  %v1532_v38 = vld [vmem:[%s1391_s6] sm:$0xff] }
  0xb9   : > { %vm488_vm0 = vcmp.gt.f32.partialorder %v1482_v50, 0.0001  ;;  %vm489_vm1 = vcmp.gt.f32.partialorder %v1490_v58, 0.0001  ;;  %v440_v28 = vmul.f32 %v1499_v3, %v1434_v17  ;;  %v434_v10 = vadd.f32 %v430_v0, %v423_v63  ;;  %v594_v17 = vld [vmem:[#allocation11 + $0x8] sm:$0xff]  ;;  %v776_v54 = vld [vmem:[%s1385_s12 + $0x20] sm:$0xff] }
  0xba   : > { %v496_v62 = vsel %vm488_vm0, %v1482_v50, 1.0  ;;  %v497_v7 = vsel %vm489_vm1, %v1490_v58, 1.0  ;;  %v441_v15 = vmul.f32 %v1499_v3, %v365_v30  ;;  %v384_v26 = vadd.f32 %v1442_v22, %v1432_v16  ;;  %v596_v30 = vld [vmem:[#allocation11 + $0x18] sm:$0xff] }
  0xbb   : > { %888 = vrcp.f32 %v496_v62  ;;  %vm490_vm2 = vcmp.gt.f32.partialorder %v1515_v19, 0.0001  ;;  %v454_v34 = vmul.f32 %v1427_v13, %v1509_v11  ;;  %v461_v35 = vmul.f32 %v1439_v20, %v1511_v12  ;;  %v1541_v20 = vld [vmem:[%s1391_s6 + $0x8] sm:$0xff]  ;;  %s1005_s6 = scalar_lea.vmem %s1556_s3, 512 }
  0xbc   : > { %890 = vrcp.f32 %v497_v7  ;;  %v424_v39 = vadd.f32 %v420_v9, %v413_v8  ;;  %v431_v16 = vmul.f32 %v1473_v41, %v361_v36  ;;  %v498_v22 = vsel %vm490_vm2, %v1515_v19, 1.0  ;;  %p1006_p0 = scmp.ne.s32.totalorder %s1556_s3, %s1005_s6  ;;  %p1013_p11 = scmp.lt.s32.totalorder %s1005_s6, %s1005_s6 }
  0xbd   : > { %v472_v13 = vmul.f32 %v1448_v25, %v1517_v21  ;;  %892 = vrcp.f32 %v498_v22  ;;  %v465_v43 = vadd.f32 %v461_v35, %v454_v34  ;;  %v483_v44 = vmul.f32 %v1455_v29, %v1522_v31 }
  0xbe   : > { %v597_v36 = vadd.f32 %v593_v33, %v1532_v38  ;;  %v444_v46 = vadd.f32 %v440_v28, %v433_v24  ;;  %v598_v47 = vadd.f32 %v594_v17, %v1541_v20  ;;  %v599_v25 = vadd.f32 %v595_v37, %v1544_v42  ;;  %p1007_p8 = pnand %p1006_p0, %p827_p10  ;;  %p1014_p1 = por %p1013_p11, %p1012_p3 }
  0xbf   : > { %v600_v48 = vadd.f32 %v596_v30, %v1549_v45  ;;  %v395_v51 = vadd.f32 %v1470_v40, %v384_v26  ;;  %v402_v52 = vmul.f32 %v1445_v23, %v1480_v49  ;;  %v476_v29 = vadd.f32 %v472_v13, %v465_v43 }
  0xc0   : > { %601 = vst [vmem:[#allocation11] sm:$0xff] %v597_v36  ;;  %v405_v55 = vadd.f32 %v401_v6, %v394_v18  ;;  %v445_v56 = vadd.f32 %v441_v15, %v434_v10  ;;  %v442_v57 = vmul.f32 %v1499_v3, %v1480_v49  ;;  %602 = vst [vmem:[#allocation11 + $0x8] sm:$0xff] %v598_v47  ;;  %p1008_p2 = pneg %p1007_p8 }
  0xc1   : > { %603 = vst [vmem:[#allocation11 + $0x10] sm:$0xff] %v599_v25  ;;  %604 = vst [vmem:[#allocation11 + $0x18] sm:$0xff] %v600_v48  ;;  %v435_v59 = vadd.f32 %v431_v16, %v424_v39  ;;  %v374_v60 = vmul.f32 %v1413_v1, %v1509_v11  ;;  %v381_v61 = vmul.f32 %v1416_v2, %v1511_v12 }
  0xc2   : > { %v1569_v62 = vadd.f32 %v483_v44, %v476_v29  ;;  %p1015_p6 = pnand %p1014_p1, %p1008_p2 }
  0xc5   : > { %v889_v40 = vpop.eup %888 }
  0xc6   : > { %1018 = shalt.err (!%p1015_p6)
}
  0xc7   : > { %s1019_s28 = scalar_lea.hbm %s1688_s5, 512 }
  0xc8   : > { %p1020_p13 = scmp.ne.s32.totalorder %s1688_s5, %s1019_s28  ;;  %p1025_p9 = scmp.lt.u32.totalorder %s1019_s28, %s1688_s5 }
  0xca   : > { %p1021_p4 = pnand %p1020_p13, %p827_p10 }
  0xcc   : > { %p1022_p7 = pneg %p1021_p4 }
  0xce   : > { %p1027_p5 = pnand %p1025_p9, %p1022_p7 }
  0xd0   : > { %1030 = shalt.err (!%p1027_p5)
}
  0xd1   : > { %s1133_s15 = smov 128   ;;  %s1134_s25 = smov 8   ;;  %v504_v1 = vmul.f32 %v889_v40, %v1513_v14  ;;  %v516_v2 = vmul.f32 %v889_v40, %v444_v46  ;;  %v891_v49 = vpop.eup %890  ;;  %v509_v63 = vld [vmem:[%s1385_s12 + $0x8] sm:$0xff]  ;;  %v406_v5 = vadd.f32 %v402_v52, %v395_v51  ;;  %v414_v6 = vmul.f32 %v1452_v27, %v1509_v11  ;;  %v510_v39 = vld [vmem:[%s1385_s12 + $0x10] sm:$0xff]  ;;  %v511_v29 = vld [vmem:[%s1385_s12 + $0x18] sm:$0xff] }
  0xd2   : > { %803 = dma.vmem_to_hbm [thread:$0]  (%p827_p10), %s1556_s3, 512, %s1688_s5, [#allocation12], %s1133_s15, %s1133_s15, %s1134_s25   ;;  %v421_v7 = vmul.f32 %v1459_v32, %v1511_v12  ;;  %vm491_vm3 = vcmp.gt.f32.partialorder %v1569_v62, 0.0001  ;;  %v505_v18 = vmul.f32 %v891_v49, %v405_v55  ;;  %v517_v24 = vmul.f32 %v891_v49, %v445_v56  ;;  %v893_v33 = vpop.eup %892 }
  0xd3   : > { %v777_v0 = vld [vmem:[%s1385_s12 + $0x28] sm:$0xff]  ;;  %v512_v8 = vsub.f32 %v504_v1, %v508_v53  ;;  %v525_v9 = vsub.f32 %v516_v2, %v776_v54  ;;  %v446_v28 = vadd.f32 %v442_v57, %v435_v59  ;;  %v385_v14 = vadd.f32 %v381_v61, %v374_v60  ;;  %v779_v53 = vld [vmem:[%s1385_s12 + $0x38] sm:$0xff] }
  0xd4   : > { %v392_v10 = vmul.f32 %v1418_v4, %v1517_v21  ;;  %v499_v27 = vsel %vm491_vm3, %v1569_v62, 1.0  ;;  %v513_v32 = vsub.f32 %v505_v18, %v509_v63  ;;  %v526_v12 = vsub.f32 %v517_v24, %v777_v0  ;;  %v778_v4 = vld [vmem:[%s1385_s12 + $0x30] sm:$0xff]  ;;  %s1135_s12 = smov [#allocation10]  }
  0xd5   : > { %v529_v11 = vmul.f32 %v512_v8, %v512_v8  ;;  %v533_v15 = vmul.f32 %v525_v9, %v525_v9  ;;  %v425_v26 = vadd.f32 %v421_v7, %v414_v6  ;;  %v432_v34 = vmul.f32 %v1473_v41, %v1517_v21  ;;  %v577_v6 = vld [vmem:[#allocation10] sm:$0xff]  ;;  %s614_s11 = sshll.u32 %s1135_s12, 4  ;;  %s615_s11 = int_to_ptr.vmem [resolvable:$true] %s614_s11 }
  0xd6   : > { %894 = vrcp.f32 %v499_v27  ;;  %v530_v17 = vmul.f32 %v513_v32, %v513_v32  ;;  %v534_v37 = vmul.f32 %v526_v12, %v526_v12  ;;  %v506_v30 = vmul.f32 %v893_v33, %v406_v5  ;;  %s1031_s27 = scalar_lea.vmem %s615_s11, 512  ;;  %p1038_p2 = scmp.lt.s32.totalorder %s615_s11, %s615_s11 }
  0xd7   : > { %v537_v35 = vadd.f32 %v533_v15, %v529_v11  ;;  %v518_v16 = vmul.f32 %v893_v33, %v446_v28  ;;  %v396_v22 = vadd.f32 %v392_v10, %v385_v14  ;;  %v403_v13 = vmul.f32 %v1445_v23, %v1522_v31  ;;  %v578_v10 = vld [vmem:[#allocation10 + $0x8] sm:$0xff]  ;;  %p1032_p12 = scmp.ne.s32.totalorder %s615_s11, %s1031_s27  ;;  %p1039_p3 = scmp.lt.s32.totalorder %s1031_s27, %s1031_s27 }
  0xd8   : > { %v443_v43 = vmul.f32 %v1499_v3, %v1522_v31  ;;  %v538_v44 = vadd.f32 %v534_v37, %v530_v17  ;;  %v514_v41 = vsub.f32 %v506_v30, %v510_v39  ;;  %v436_v36 = vadd.f32 %v432_v34, %v425_v26  ;;  %v579_v26 = vld [vmem:[#allocation10 + $0x10] sm:$0xff] }
  0xd9   : > { %896 = vrsqrt.f32 %v537_v35  ;;  %v527_v21 = vsub.f32 %v518_v16, %v778_v4  ;;  %v407_v25 = vadd.f32 %v403_v13, %v396_v22  ;;  %v492_v56 = vsub.f32 0.0001, %v1482_v50  ;;  %p1033_p0 = pnand %p1032_p12, %p827_p10  ;;  %p1040_p11 = por %p1039_p3, %p1038_p2 }
  0xda   : > { %898 = vrsqrt.f32 %v538_v44  ;;  %v531_v46 = vmul.f32 %v514_v41, %v514_v41  ;;  %v447_v48 = vadd.f32 %v443_v43, %v436_v36  ;;  %vm543_vm4 = vcmp.eq.f32.partialorder %v537_v35, inf }
  0xdb   : > { %v535_v47 = vmul.f32 %v527_v21, %v527_v21  ;;  %v546_v3 = vand.u32 2147483648, %v537_v35  ;;  %vm545_vm5 = vcmp.eq.f32.partialorder %v537_v35, 0.0  ;;  %vm550_vm6 = vcmp.eq.f32.partialorder %v538_v44, inf  ;;  %p1034_p8 = pneg %p1033_p0 }
  0xdc   : > { %v553_v61 = vand.u32 2147483648, %v538_v44  ;;  %v493_v63 = vsub.f32 0.0001, %v1490_v58  ;;  %vm552_vm7 = vcmp.eq.f32.partialorder %v538_v44, 0.0  ;;  %v494_v50 = vsub.f32 0.0001, %v1515_v19 }
  0xdd   : > { %v539_v51 = vadd.f32 %v535_v47, %v531_v46  ;;  %v580_v19 = vld [vmem:[#allocation10 + $0x18] sm:$0xff]  ;;  %p1041_p1 = pnand %p1040_p11, %p1034_p8 }
  0xdf   : > { %900 = vrsqrt.f32 %v539_v51  ;;  %vm557_vm8 = vcmp.eq.f32.partialorder %v539_v51, inf  ;;  %v560_v27 = vand.u32 2147483648, %v539_v51  ;;  %vm559_vm9 = vcmp.eq.f32.partialorder %v539_v51, 0.0 }
  0xe0   : > { %v895_v52 = vpop.eup %894 }
  0xe1   : > { %v507_v54 = vmul.f32 %v895_v52, %v407_v25  ;;  %v519_v55 = vmul.f32 %v895_v52, %v447_v48 }
  0xe3   : > { %v897_v23 = vpop.eup %896  ;;  %v515_v57 = vsub.f32 %v507_v54, %v511_v29  ;;  %v528_v40 = vsub.f32 %v519_v55, %v779_v53 }
  0xe4   : > { %v542_v31 = vmul.f32 %v897_v23, %v537_v35  ;;  %v899_v59 = vpop.eup %898 }
  0xe5   : > { %v532_v1 = vmul.f32 %v515_v57, %v515_v57  ;;  %v536_v2 = vmul.f32 %v528_v40, %v528_v40  ;;  %v549_v0 = vmul.f32 %v899_v59, %v538_v44 }
  0xe6   : > { %v544_v60 = vsel %vm543_vm4, %v537_v35, %v542_v31 }
  0xe7   : > { %v547_v49 = vsel %vm545_vm5, %v546_v3, %v544_v60  ;;  %v540_v7 = vadd.f32 %v536_v2, %v532_v1  ;;  %v551_v9 = vsel %vm550_vm6, %v538_v44, %v549_v0 }
  0xe8   : > { %v569_v5 = vsel %vm488_vm0, %v547_v49, %v492_v56  ;;  %v554_v18 = vsel %vm552_vm7, %v553_v61, %v551_v9 }
  0xe9   : > { %v581_v8 = vmul.f32 %v1532_v38, %v569_v5  ;;  %902 = vrsqrt.f32 %v540_v7  ;;  %v901_v24 = vpop.eup %900  ;;  %v570_v14 = vsel %vm489_vm1, %v554_v18, %v493_v63  ;;  %vm564_vm10 = vcmp.eq.f32.partialorder %v540_v7, inf }
  0xea   : > { %v582_v11 = vmul.f32 %v1541_v20, %v570_v14  ;;  %v556_v15 = vmul.f32 %v901_v24, %v539_v51  ;;  %v567_v17 = vand.u32 2147483648, %v540_v7  ;;  %v495_v20 = vsub.f32 0.0001, %v1569_v62 }
  0xeb   : > { %v585_v28 = vadd.f32 %v581_v8, %v577_v6  ;;  %vm566_vm11 = vcmp.eq.f32.partialorder %v540_v7, 0.0 }
  0xec   : > { %v586_v32 = vadd.f32 %v582_v11, %v578_v10  ;;  %v558_v38 = vsel %vm557_vm8, %v539_v51, %v556_v15 }
  0xed   : > { %589 = vst [vmem:[#allocation10] sm:$0xff] %v585_v28  ;;  %v561_v12 = vsel %vm559_vm9, %v560_v27, %v558_v38 }
  0xee   : > { %590 = vst [vmem:[#allocation10 + $0x8] sm:$0xff] %v586_v32  ;;  %v571_v33 = vsel %vm490_vm2, %v561_v12, %v494_v50 }
  0xef   : > { %v583_v58 = vmul.f32 %v1544_v42, %v571_v33 }
  0xf1   : > { %v587_v34 = vadd.f32 %v583_v58, %v579_v26 }
  0xf3   : > { %v903_v35 = vpop.eup %902  ;;  %591 = vst [vmem:[#allocation10 + $0x10] sm:$0xff] %v587_v34 }
  0xf4   : > { %v563_v37 = vmul.f32 %v903_v35, %v540_v7 }
  0xf6   : > { %v565_v30 = vsel %vm564_vm10, %v540_v7, %v563_v37 }
  0xf7   : > { %v568_v39 = vsel %vm566_vm11, %v567_v17, %v565_v30 }
  0xf8   : > { %v572_v4 = vsel %vm491_vm3, %v568_v39, %v495_v20 }
  0xf9   : > { %v584_v42 = vmul.f32 %v1549_v45, %v572_v4 }
  0xfb   : > { %v588_v16 = vadd.f32 %v584_v42, %v580_v19 }
  0xfd   : > { %592 = vst [vmem:[#allocation10 + $0x18] sm:$0xff] %v588_v16 }
  0xfe   : > { %1044 = shalt.err (!%p1041_p1)
}
  0xff   : > { %s1045_s10 = scalar_lea.hbm %s1687_s4, 512 }
 0x100   : > { %p1046_p6 = scmp.ne.s32.totalorder %s1687_s4, %s1045_s10  ;;  %p1051_p7 = scmp.lt.u32.totalorder %s1045_s10, %s1687_s4 }
 0x102   : > { %p1047_p13 = pnand %p1046_p6, %p827_p10 }
 0x104   : > { %p1048_p4 = pneg %p1047_p13 }
 0x106   : > { %p1053_p9 = pnand %p1051_p7, %p1048_p4 }
 0x108   : > { %1056 = shalt.err (!%p1053_p9)
}
 0x109   : > { %801 = dma.vmem_to_hbm [thread:$0]  (%p827_p10), %s615_s11, 512, %s1687_s4, [#allocation4], %s1133_s15, %s1133_s15, %s1134_s25  }
 0x10a   : > { %1094 = dma.done.wait (%p827_p10), [#allocation4], 512  }
 0x10b   : > { %1096 = vsyncadd (%p827_p10), [#allocation4], 4294966784 }
 0x10c   : > { %1098 = dma.done.wait (%p827_p10), [#allocation12], 512  }
 0x10d   : > { %1100 = vsyncadd (%p827_p10), [#allocation12], 4294966784 }
 0x10e PF: > { %s23_s23 = sadd.s32 1, %s1123_s23   ;;  %s1711_s18 = smov %s1107_s19 }
 0x10f   : > { %p20_p5 = scmp.ge.s32.totalorder %s23_s23, 6   ;;  %s1712_s19 = smov %s1111_s20 }
 0x110   : > { %s1713_s20 = smov %s1213_s30  ;;  %s1714_s21 = smov %s1119_s22 }
 0x111   : > { %s1715_s22 = smov %s1717_s24  ;;  %22 = sbr.rel (!%p20_p5) target bundleno = 13 (0xd), region = 113 }
 0x118   :  { %650 = vsyncpa [#allocation3], 1 }
 0x119   :  { %652 = vsyncpa [#allocation3 + $0x1], 1 }
 0x11a   :  { %653 = vsyncpa [#allocation8], 1 }
 0x11b   :  { %655 = vsyncpa [#allocation8 + $0x1], 1 }
 0x11c   :  { %656 = vsyncpa [#allocation4], 1 }
 0x11d   :  { %658 = vsyncpa [#allocation4 + $0x1], 1 }
 0x11e   :  { %659 = vsyncpa [#allocation12], 1 }
 0x11f   :  { %660 = vsyncpa [#allocation5], 1 }
 0x120   :  { %662 = vsyncpa [#allocation5 + $0x1], 1 }

</bundles_post_ra>
